<compile_context>
chip_gen: v7x
topology: tpu7x:2x2x1
jax: 0.10.0
libtpu: 0.0.40
codegen_flags: <defaults>
</compile_context>

<pallas_src>
import jax
import jax.numpy as jnp
from jax.experimental import pallas as pl
from jax.experimental.pallas import tpu as pltpu

HIDDEN = 64
MAX_TILE_B = 4096                      # amortize per-grid-step overhead
VMEM_LIMIT_BYTES = 48 * 1024 * 1024    # headroom under v7x's 64 MiB physical VMEM


def _round_up(a, b):
    return ((a + b - 1) // b) * b


def _choose_tile_b(batch):
    """Pick the batch tile size.

    * Big tiles (<= MAX_TILE_B rows) so grid-step overhead is amortized.
    * For batches >= 128 rows keep at least 2 grid steps so the "parallel" batch axis
      can shard across v7x's two TensorCores (harmless on v5e/v6e single-TC chips).
    * tile_b is a multiple of 8 (sublane); ragged last blocks are handled by Pallas
      (OOB writes are masked), so no wrapper-side padding pass over x is needed.
    """
    if batch < 128:
        return max(8, _round_up(batch, 8))
    return min(MAX_TILE_B, _round_up(pl.cdiv(batch, 2), 8))


def qnet_kernel(x_ref, w1_ref, b1_ref, w2_ref, b2_ref, w3_ref, b3_ref, o_ref):
    # x_ref: (tile_b, in) f32 -> cast to bf16 in-kernel (cheap VPU pack, avoids an
    #        extra wrapper HBM pass).  Weights: bf16, VMEM-resident.  Biases: f32.
    # o_ref: (tile_b, out_size) f32, narrow/unpadded.
    x = x_ref[...].astype(jnp.bfloat16)

    h1 = jnp.dot(x, w1_ref[...], preferred_element_type=jnp.float32) + b1_ref[...]
    h1 = jnp.maximum(h1, 0.0)          # ReLU in f32 (safe on v5e's f32-only VPU)

    h2 = jnp.dot(h1.astype(jnp.bfloat16), w2_ref[...],
                 preferred_element_type=jnp.float32) + b2_ref[...]
    h2 = jnp.maximum(h2, 0.0)

    out = jnp.dot(h2.astype(jnp.bfloat16), w3_ref[...],
                  preferred_element_type=jnp.float32) + b3_ref[...]
    o_ref[...] = out.astype(o_ref.dtype)


def prepare_params(params):
    """One-time weight preparation (hoisted out of the per-call forward path).

    Weights are stored as [in_features, out_features] (transposed from PyTorch's
    [out, in]) so the kernel computes y = x @ W + b directly on the MXU.
    """
    return dict(
        w1=params["w1"].astype(jnp.bfloat16),
        b1=params["b1"].astype(jnp.float32).reshape(1, -1),
        w2=params["w2"].astype(jnp.bfloat16),
        b2=params["b2"].astype(jnp.float32).reshape(1, -1),
        w3=params["w3"].astype(jnp.bfloat16),
        b3=params["b3"].astype(jnp.float32).reshape(1, -1),
    )


def transportation_qnetwork_forward(x, prepared):
    """x: [B, input_size] float32.  prepared: output of prepare_params()."""
    B, in_size = x.shape
    out_size = prepared["w3"].shape[1]

    tile_b = _choose_tile_b(B)
    grid = (pl.cdiv(B, tile_b),)

    x_spec = pl.BlockSpec((tile_b, in_size), lambda i: (i, 0))
    resident = lambda arr: pl.BlockSpec(arr.shape, lambda i: (0, 0))
    out_spec = pl.BlockSpec((tile_b, out_size), lambda i: (i, 0))

    flops = 2 * B * (in_size * HIDDEN + HIDDEN * HIDDEN + HIDDEN * out_size)
    bytes_accessed = (
        B * in_size * 4                                                   # x (f32 in)
        + B * out_size * 4                                                # out (f32)
        + (in_size * HIDDEN + HIDDEN * HIDDEN + HIDDEN * out_size) * 2    # bf16 weights
        + (2 * HIDDEN + out_size) * 4                                     # f32 biases
    )

    return pl.pallas_call(
        qnet_kernel,
        out_shape=jax.ShapeDtypeStruct((B, out_size), jnp.float32),
        grid=grid,
        in_specs=[x_spec,
                  resident(prepared["w1"]), resident(prepared["b1"]),
                  resident(prepared["w2"]), resident(prepared["b2"]),
                  resident(prepared["w3"]), resident(prepared["b3"])],
        out_specs=out_spec,
        compiler_params=pltpu.CompilerParams(
            dimension_semantics=("parallel",),
            vmem_limit_bytes=VMEM_LIMIT_BYTES),
        cost_estimate=pl.CostEstimate(
            flops=flops, transcendentals=0, bytes_accessed=bytes_accessed),
    )(x, prepared["w1"], prepared["b1"], prepared["w2"], prepared["b2"],
      prepared["w3"], prepared["b3"])


def init_params(key, input_size, output_size, hidden=HIDDEN):
    """Deterministic init mimicking PyTorch's default U(-1/sqrt(fan_in), 1/sqrt(fan_in))."""
    ks = jax.random.split(key, 6)

    def linear(kw, kb, fan_in, fan_out):
        bound = 1.0 / jnp.sqrt(fan_in)
        w = jax.random.uniform(kw, (fan_in, fan_out), jnp.float32, -bound, bound)
        b = jax.random.uniform(kb, (1, fan_out), jnp.float32, -bound, bound)
        return w, b

    w1, b1 = linear(ks[0], ks[1], input_size, hidden)
    w2, b2 = linear(ks[2], ks[3], hidden, hidden)
    w3, b3 = linear(ks[4], ks[5], hidden, output_size)
    return dict(w1=w1, b1=b1, w2=w2, b2=b2, w3=w3, b3=b3)


def reference_forward_f32(x, p):
    h1 = jnp.maximum(x @ p["w1"] + p["b1"], 0.0)
    h2 = jnp.maximum(h1 @ p["w2"] + p["b2"], 0.0)
    return h2 @ p["w3"] + p["b3"]


def reference_forward_bf16(x, p):
    """Reference matching the kernel's bf16-input / f32-accumulate precision."""
    bf = jnp.bfloat16
    h1 = jnp.dot(x.astype(bf), p["w1"].astype(bf),
                 preferred_element_type=jnp.float32) + p["b1"]
    h1 = jnp.maximum(h1, 0.0)
    h2 = jnp.dot(h1.astype(bf), p["w2"].astype(bf),
                 preferred_element_type=jnp.float32) + p["b2"]
    h2 = jnp.maximum(h2, 0.0)
    return jnp.dot(h2.astype(bf), p["w3"].astype(bf),
                   preferred_element_type=jnp.float32) + p["b3"]


if __name__ == "__main__":
    key = jax.random.PRNGKey(0)
    k_params, k_x = jax.random.split(key)

    batch = 200          # ragged vs tile_b=104 -> exercises 2 grid steps + masked edge
    input_size = 16      # e.g. transportation state features
    output_size = 4      # e.g. routing actions

    params = init_params(k_params, input_size, output_size)
    prepared = prepare_params(params)   # hoisted, one-time weight prep
    x = jax.random.normal(k_x, (batch, input_size), jnp.float32)

    out = transportation_qnetwork_forward(x, prepared)
    out = jax.block_until_ready(out)
    assert out.shape == (batch, output_size)

    ref_bf16 = reference_forward_bf16(x, params)
    ref_f32 = reference_forward_f32(x, params)
    assert jnp.allclose(out, ref_bf16, atol=2e-3, rtol=2e-3), \
        "mismatch vs bf16-precision JAX reference"
    assert jnp.allclose(out, ref_f32, atol=5e-2, rtol=5e-2), \
        "mismatch vs f32 JAX reference"

    print("KERNEL_OK")
</pallas_src>

<mosaic_0001>
module attributes {stable_mosaic.version = 11 : i64} {
  func.func @qnet_kernel(%arg0: i32, %arg1: memref<104x16xf32, #tpu.memory_space<vmem>>, %arg2: memref<16x64xbf16, #tpu.memory_space<vmem>>, %arg3: memref<1x64xf32, #tpu.memory_space<vmem>>, %arg4: memref<64x64xbf16, #tpu.memory_space<vmem>>, %arg5: memref<1x64xf32, #tpu.memory_space<vmem>>, %arg6: memref<64x4xbf16, #tpu.memory_space<vmem>>, %arg7: memref<1x4xf32, #tpu.memory_space<vmem>>, %arg8: memref<104x4xf32, #tpu.memory_space<vmem>>) attributes {dimension_semantics = [#tpu.dimension_semantics<parallel>], iteration_bounds = array<i64: 2>, scalar_prefetch = 0 : i64, scratch_operands = 0 : i64, tpu.core_type = #tpu.core_type<tc>, window_params = [{transform_indices = @transform_0, window_bounds = array<i64: 104, 16>}, {pipeline_mode = #tpu.pipeline_mode<synchronous>, transform_indices = @transform_1, window_bounds = array<i64: 16, 64>}, {pipeline_mode = #tpu.pipeline_mode<synchronous>, transform_indices = @transform_2, window_bounds = array<i64: 1, 64>}, {pipeline_mode = #tpu.pipeline_mode<synchronous>, transform_indices = @transform_3, window_bounds = array<i64: 64, 64>}, {pipeline_mode = #tpu.pipeline_mode<synchronous>, transform_indices = @transform_4, window_bounds = array<i64: 1, 64>}, {pipeline_mode = #tpu.pipeline_mode<synchronous>, transform_indices = @transform_5, window_bounds = array<i64: 64, 4>}, {pipeline_mode = #tpu.pipeline_mode<synchronous>, transform_indices = @transform_6, window_bounds = array<i64: 1, 4>}, {transform_indices = @transform_7, window_bounds = array<i64: 104, 4>}]} {
    %c0 = arith.constant 0 : index
    %c0_0 = arith.constant 0 : index
    %0 = vector.load %arg1[%c0, %c0_0] : memref<104x16xf32, #tpu.memory_space<vmem>>, vector<104x16xf32>
    %1 = arith.truncf %0 : vector<104x16xf32> to vector<104x16xbf16>
    %c0_1 = arith.constant 0 : index
    %c0_2 = arith.constant 0 : index
    %2 = vector.load %arg2[%c0_1, %c0_2] : memref<16x64xbf16, #tpu.memory_space<vmem>>, vector<16x64xbf16>
    %cst = arith.constant dense<0.000000e+00> : vector<104x64xf32>
    %3 = tpu.matmul %1, %2, %cst {dimension_numbers = #tpu.dot_dimension_numbers<[1], [0], [0], [1], [0, 0, 1, 1], [], []>} : vector<104x16xbf16>, vector<16x64xbf16>, vector<104x64xf32> -> vector<104x64xf32>
    %c0_3 = arith.constant 0 : index
    %c0_4 = arith.constant 0 : index
    %4 = vector.load %arg3[%c0_3, %c0_4] : memref<1x64xf32, #tpu.memory_space<vmem>>, vector<1x64xf32>
    %5 = vector.broadcast %4 : vector<1x64xf32> to vector<104x64xf32>
    %6 = arith.addf %3, %5 : vector<104x64xf32>
    %cst_5 = arith.constant 0.000000e+00 : f32
    %7 = vector.broadcast %cst_5 : f32 to vector<104x64xf32>
    %8 = arith.maximumf %6, %7 : vector<104x64xf32>
    %9 = arith.truncf %8 : vector<104x64xf32> to vector<104x64xbf16>
    %c0_6 = arith.constant 0 : index
    %c0_7 = arith.constant 0 : index
    %10 = vector.load %arg4[%c0_6, %c0_7] : memref<64x64xbf16, #tpu.memory_space<vmem>>, vector<64x64xbf16>
    %cst_8 = arith.constant dense<0.000000e+00> : vector<104x64xf32>
    %11 = tpu.matmul %9, %10, %cst_8 {dimension_numbers = #tpu.dot_dimension_numbers<[1], [0], [0], [1], [0, 0, 1, 1], [], []>} : vector<104x64xbf16>, vector<64x64xbf16>, vector<104x64xf32> -> vector<104x64xf32>
    %c0_9 = arith.constant 0 : index
    %c0_10 = arith.constant 0 : index
    %12 = vector.load %arg5[%c0_9, %c0_10] : memref<1x64xf32, #tpu.memory_space<vmem>>, vector<1x64xf32>
    %13 = vector.broadcast %12 : vector<1x64xf32> to vector<104x64xf32>
    %14 = arith.addf %11, %13 : vector<104x64xf32>
    %cst_11 = arith.constant 0.000000e+00 : f32
    %15 = vector.broadcast %cst_11 : f32 to vector<104x64xf32>
    %16 = arith.maximumf %14, %15 : vector<104x64xf32>
    %17 = arith.truncf %16 : vector<104x64xf32> to vector<104x64xbf16>
    %c0_12 = arith.constant 0 : index
    %c0_13 = arith.constant 0 : index
    %18 = vector.load %arg6[%c0_12, %c0_13] : memref<64x4xbf16, #tpu.memory_space<vmem>>, vector<64x4xbf16>
    %cst_14 = arith.constant dense<0.000000e+00> : vector<104x4xf32>
    %19 = tpu.matmul %17, %18, %cst_14 {dimension_numbers = #tpu.dot_dimension_numbers<[1], [0], [0], [1], [0, 0, 1, 1], [], []>} : vector<104x64xbf16>, vector<64x4xbf16>, vector<104x4xf32> -> vector<104x4xf32>
    %c0_15 = arith.constant 0 : index
    %c0_16 = arith.constant 0 : index
    %20 = vector.load %arg7[%c0_15, %c0_16] : memref<1x4xf32, #tpu.memory_space<vmem>>, vector<1x4xf32>
    %21 = vector.broadcast %20 : vector<1x4xf32> to vector<104x4xf32>
    %22 = arith.addf %19, %21 : vector<104x4xf32>
    %c0_17 = arith.constant 0 : index
    %c0_18 = arith.constant 0 : index
    %23 = vector.load %arg8[%c0_17, %c0_18] : memref<104x4xf32, #tpu.memory_space<vmem>>, vector<104x4xf32>
    tpu.vector_store %arg8[%c0_17, %c0_18], %22 {strides = array<i32>} : memref<104x4xf32, #tpu.memory_space<vmem>>, vector<104x4xf32>,
    return
  }
  func.func @transform_0(%arg0: i32) -> (i32, i32) {
    %c0_i32 = arith.constant 0 : i32
    %c0_i32_0 = arith.constant 0 : i32
    return %arg0, %c0_i32 : i32, i32
  }
  func.func @transform_1(%arg0: i32) -> (i32, i32) {
    %c0_i32 = arith.constant 0 : i32
    %c0_i32_0 = arith.constant 0 : i32
    %c0_i32_1 = arith.constant 0 : i32
    return %c0_i32, %c0_i32_0 : i32, i32
  }
  func.func @transform_2(%arg0: i32) -> (i32, i32) {
    %c0_i32 = arith.constant 0 : i32
    %c0_i32_0 = arith.constant 0 : i32
    %c0_i32_1 = arith.constant 0 : i32
    return %c0_i32, %c0_i32_0 : i32, i32
  }
  func.func @transform_3(%arg0: i32) -> (i32, i32) {
    %c0_i32 = arith.constant 0 : i32
    %c0_i32_0 = arith.constant 0 : i32
    %c0_i32_1 = arith.constant 0 : i32
    return %c0_i32, %c0_i32_0 : i32, i32
  }
  func.func @transform_4(%arg0: i32) -> (i32, i32) {
    %c0_i32 = arith.constant 0 : i32
    %c0_i32_0 = arith.constant 0 : i32
    %c0_i32_1 = arith.constant 0 : i32
    return %c0_i32, %c0_i32_0 : i32, i32
  }
  func.func @transform_5(%arg0: i32) -> (i32, i32) {
    %c0_i32 = arith.constant 0 : i32
    %c0_i32_0 = arith.constant 0 : i32
    %c0_i32_1 = arith.constant 0 : i32
    return %c0_i32, %c0_i32_0 : i32, i32
  }
  func.func @transform_6(%arg0: i32) -> (i32, i32) {
    %c0_i32 = arith.constant 0 : i32
    %c0_i32_0 = arith.constant 0 : i32
    %c0_i32_1 = arith.constant 0 : i32
    return %c0_i32, %c0_i32_0 : i32, i32
  }
  func.func @transform_7(%arg0: i32) -> (i32, i32) {
    %c0_i32 = arith.constant 0 : i32
    %c0_i32_0 = arith.constant 0 : i32
    return %arg0, %c0_i32 : i32, i32
  }
}

</mosaic_0001>

<bundles_post_ra>
// kernel: tpu_custom_call.1
= control target key start
LH: loop header
LB: loop body
LE: loop exit
PB: predicated region body
PF: predicated region fallthrough
CT: control target
= control target key end

     0   :  { %s1482_s24 = smov 0   ;;  %s1484_s25 = smov 0   ;;  %s1791_s0 = inlined_call_operand.vmem [shape: f32[200,16], index: 0, kind: input, shape index: {}]   ;;  %s1792_s1 = inlined_call_operand.vmem [shape: bf16[16,64], index: 1, kind: input, shape index: {}]   ;;  %s1793_s2 = inlined_call_operand.vmem [shape: f32[1,64], index: 2, kind: input, shape index: {}]   ;;  %s1794_s3 = inlined_call_operand.vmem [shape: bf16[64,64], index: 3, kind: input, shape index: {}]   ;;  %s1795_s4 = inlined_call_operand.vmem [shape: f32[1,64], index: 4, kind: input, shape index: {}]   ;;  %s1796_s5 = inlined_call_operand.vmem [shape: bf16[64,4], index: 5, kind: input, shape index: {}]   ;;  %s1797_s6 = inlined_call_operand.vmem [shape: f32[1,4], index: 6, kind: input, shape index: {}]   ;;  %s1798_s7 = inlined_call_operand.vmem [shape: f32[200,4], index: 7, kind: output, shape index: {}]  }
   0x1   :  { %s1486_s26 = smov 0  }
   0x2 LB: > { %s1495_s27 = sadd.s32 4294967295, %s1406_s26   ;;  %s1497_s28 = sadd.s32 1, %s1406_s26   ;;  %s1406_s26 = sphi %s1486_s26, %s1805_s26   ;;  %s1402_s25 = sphi %s1484_s25, %s1804_s25   ;;  %s1398_s24 = sphi %s1482_s24, %s1803_s24  }
   0x3   : > { %s173_s29 = ssub.s32 %s1406_s26, %s1497_s28  ;;  %s176_s30 = sadd.s32 1, %s1402_s25 }
   0x4   : > { %p174_p0 = scmp.eq.s32.totalorder %s173_s29, 0  ;;  %p186_p1 = scmp.ne.s32.totalorder %s1402_s25, %s1398_s24 }
   0x5   : > { %p187_p2 = scmp.eq.s32.totalorder %s1495_s27, 1  ;;  %p1065_p3 = scmp.ge.s32.totalorder %s1406_s26, 1 }
   0x6   : > { %s1505_s8 = scalar_select %p174_p0, %s1402_s25, %s176_s30  }
   0x7   : > { %p1507_p4 = por %p187_p2, %p186_p1  ;;  %p246_p5 = scmp.lt.s32.totalorder %s1406_s26, 3 }
   0x9   : > { %p247_p6 = pnand %p1065_p3, %p246_p5 }
   0xa   : > { %v1339_v0 = vld [vmem:[%s1792_s1] sm:$0xff] (!%p247_p6)   ;;  %v1440_v1 = vmov (!%p247_p6), 0.0   ;;  %s1516_s12 = smul.u32 (!%p247_p6), 13, %s1495_s27  ;;  %vm1441_vm0 = vmmov (!%p247_p6), 0   ;;  %vm336_vm1 = vcmask (!%p247_p6), 130048   ;;  %v1341_v14 = vld [vmem:[%s1794_s3 + $0x8] sm:$0xff] (!%p247_p6)  }
   0xb   : > { %250 = sbr.rel (%p247_p6) target bundleno = 789 (0x315), region = 48  ;;  %1143 = vmatprep.subr.bf16.mxu0 (!%p247_p6), %v1440_v1  ;;  %1245 = vmatprep.subr.bf16.mxu1 (!%p247_p6), %v1440_v1  ;;  %v1340_v7 = vld [vmem:[%s1794_s3] sm:$0xff] (!%p247_p6)   ;;  %v1342_v16 = vld [vmem:[%s1794_s3 + $0x10] sm:$0xff] (!%p247_p6)   ;;  %v1343_v25 = vld [vmem:[%s1794_s3 + $0x18] sm:$0xff] (!%p247_p6)   ;;  %vm505_vm2 = vcmask (!%p247_p6), 523264   ;;  %s278_s22 = sand.u32 (!%p247_p6), 1, %s1398_s24  }
   0xc   : > { %1144 = vmatpush3.bf16.msra.mxu0 (!%p247_p6), %v1339_v0  ;;  %1145 = vmatprep.mubr.msk.bf16.mxu0 (!%p247_p6), %vm1441_vm0, %v1440_v1  ;;  %p286_p7 = scmp.lt.s32.totalorder (!%p247_p6), %s1516_s12, 24  ;;  %v1344_v26 = vld [vmem:[%s1796_s5] sm:$0xff] (!%p247_p6)   ;;  %v1345_v27 = vld [vmem:[%s1796_s5 + $0x8] sm:$0xff] (!%p247_p6)   ;;  %v1346_v28 = vld [vmem:[%s1796_s5 + $0x10] sm:$0xff] (!%p247_p6)   ;;  %s1247_s23 = smul.u32 (!%p247_p6), 104, %s278_s22  ;;  %vm783_vm3 = vcmask (!%p247_p6), 31744  }
   0xd   : > { %1246 = vmatpush3.bf16.msra.mxu1 (!%p247_p6), %v1339_v0  ;;  %1161 = vmatprep.mubr.msk.bf16.mxu1 (!%p247_p6), %vm1441_vm0, %v1440_v1  ;;  %v1596_v29 = vld [vmem:[%s1793_s2] ss:$0 sm:$0xff] (!%p247_p6) }
   0xe   : > { %1173 = vmatprep.subr.bf16.mxu1 (!%p247_p6), %v1440_v1  ;;  %1209 = vmatprep.subr.bf16.mxu0 (!%p247_p6), %v1440_v1  ;;  %s1674_s30 = scalar_lea.vmem (!%p247_p6), [#allocation2], %s1247_s23  }
  0x12   : > { %s287_s13 = scalar_select %p286_p7, %s1516_s12, 24 }
  0x13   : > { %s805_s24 = ssub.s32 (%p1507_p4), 25, %s1516_s12  ;;  %s1112_s10 = smul.u32 (%p1507_p4), 104, %s1495_s27 }
  0x14   : > { %s1066_s14 = sshll.u32 %s287_s13, 3  ;;  %p806_p8 = scmp.lt.s32.totalorder (%p1507_p4), %s805_s24, 13 }
  0x15   : > { %s1530_s17 = scalar_lea.vmem %s1791_s0, %s1066_s14  ;;  %s1709_s14 = scalar_lea.vmem (%p1507_p4), %s1798_s7, %s1112_s10  }
  0x16   : > { %v301_v2 = vld [vmem:[%s1530_s17] sm:$0xff]  ;;  %v302_v3 = vld [vmem:[%s1530_s17 + $0x8] sm:$0xff]  ;;  %v303_v8 = vld [vmem:[%s1530_s17 + $0x10] sm:$0xff] }
  0x17   : > { %v314_v4 = vpack.c.bf16 %v302_v3, %v301_v2  ;;  %v309_v5 = vld [vmem:[%s1530_s17 + $0x40] sm:$0xff]  ;;  %v310_v6 = vld [vmem:[%s1530_s17 + $0x48] sm:$0xff]  ;;  %v304_v9 = vld [vmem:[%s1530_s17 + $0x18] sm:$0xff] }
  0x18   : > { %v318_v10 = vpack.c.bf16 %v310_v6, %v309_v5  ;;  %v315_v11 = vpack.c.bf16 %v304_v9, %v303_v8  ;;  %v311_v12 = vld [vmem:[%s1530_s17 + $0x50] sm:$0xff]  ;;  %v312_v13 = vld [vmem:[%s1530_s17 + $0x58] sm:$0xff]  ;;  %v305_v17 = vld [vmem:[%s1530_s17 + $0x20] sm:$0xff] }
  0x19   : > { %1146 = vmatmul.mubr.msk.bf16.vlgmr.msra.gmra.mrb[0].mxu0 %vm336_vm1, %v314_v4  ;;  %v319_v15 = vpack.c.bf16 %v312_v13, %v311_v12  ;;  %v306_v18 = vld [vmem:[%s1530_s17 + $0x28] sm:$0xff]  ;;  %v313_v20 = vld [vmem:[%s1530_s17 + $0x60] sm:$0xff]  ;;  %v307_v22 = vld [vmem:[%s1530_s17 + $0x30] sm:$0xff] }
  0x1a   : > { %1149 = vmatprep.mubr.msk.bf16.mxu0 %vm1441_vm0, %v1440_v1  ;;  %1162 = vmatmul.mubr.msk.bf16.vlgmr.msra.gmra.mrb[0].mxu1 %vm336_vm1, %v318_v10  ;;  %v316_v19 = vpack.c.bf16 %v306_v18, %v305_v17  ;;  %v320_v21 = vpack.c.bf16 %v313_v20, %v313_v20  ;;  %v308_v23 = vld [vmem:[%s1530_s17 + $0x38] sm:$0xff] }
  0x1b   : > { %1165 = vmatprep.mubr.msk.bf16.mxu1 %vm1441_vm0, %v1440_v1  ;;  %1174 = vmatpush3.bf16.msra.mxu1 %v1340_v7  ;;  %v317_v24 = vpack.c.bf16 %v308_v23, %v307_v22 }
  0x1c   : > { %1175 = vmatprep.subr.bf16.mxu1 %v1440_v1  ;;  %1210 = vmatpush3.bf16.msra.mxu0 %v1344_v26 }
  0x1d   : > { %1211 = vmatprep.subr.bf16.mxu0 %v1440_v1 }
  0x1f   : > { %1176 = vmatpush3.bf16.msra.mxu1 %v1341_v14 }
  0x20   : > { %1177 = vmatprep.subr.bf16.mxu1 %v1440_v1  ;;  %1212 = vmatpush3.bf16.msra.mxu0 %v1345_v27 }
  0x21   : > { %1150 = vmatmul.mubr.msk.bf16.gmra.mrb[4].mxu0 %vm336_vm1, %v315_v11  ;;  %1213 = vmatprep.subr.bf16.mxu0 %v1440_v1 }
  0x22   : > { %1153 = vmatprep.mubr.msk.bf16.mxu0 %vm1441_vm0, %v1440_v1  ;;  %1166 = vmatmul.mubr.msk.bf16.gmra.mrb[4].mxu1 %vm336_vm1, %v319_v15 }
  0x23   : > { %1169 = vmatprep.mubr.msk.bf16.mxu1 %vm1441_vm0, %v1440_v1  ;;  %1178 = vmatpush3.bf16.msra.mxu1 %v1342_v16 }
  0x24   : > { %1179 = vmatprep.subr.bf16.mxu1 %v1440_v1  ;;  %1214 = vmatpush3.bf16.msra.mxu0 %v1346_v28  ;;  %v1347_v28 = vld [vmem:[%s1796_s5 + $0x18] sm:$0xff]  }
  0x25   : > { %1215 = vmatprep.subr.bf16.mxu0 %v1440_v1 }
  0x27   : > { %1180 = vmatpush3.bf16.msra.mxu1 %v1343_v25 }
  0x28   : > { %1216 = vmatpush3.bf16.msra.mxu0 %v1347_v28  ;;  %v1088_v28 = vld [vmem:[%s1797_s6] ss:$0 sm:$0xff] }
  0x29   : > { %1154 = vmatmul.mubr.msk.bf16.gmra.mrb[8].mxu0 %vm336_vm1, %v316_v19 }
  0x2a   : > { %1157 = vmatprep.mubr.msk.bf16.mxu0 %vm1441_vm0, %v1440_v1  ;;  %1170 = vmatmul.mubr.msk.bf16.gmra.mrb[8].mxu1 %vm336_vm1, %v320_v21 }
  0x2b   : > { %1181 = vmatprep.mubr.msk.bf16.mxu1 %vm1441_vm0, %v1440_v1 }
  0x31   : > { %1158 = vmatmul.mubr.msk.bf16.gmra.mrb[12].mxu0 %vm336_vm1, %v317_v24 }
  0x32   : > { %1217 = vmatprep.mubr.msk.bf16.mxu0 %vm1441_vm0, %v1440_v1 }
  0xec   : > { %v392_v30 = vpop.f32.mrb[0].mxu0 }
  0xed   : > { %v393_v31 = vadd.f32 %v1596_v29, %v392_v30  ;;  %v1147_v32 = vpop.f32.mrb[1].mxu0  ;;  %v424_v36 = vpop.f32.mrb[0].mxu1  ;;  %v1636_v30 = vld [vmem:[%s1795_s4] ss:$0 sm:$0xff] }
  0xee   : > { %v395_v33 = vpop.f32.mrb[2].mxu0  ;;  %v425_v37 = vadd.f32 %v1596_v29, %v424_v36  ;;  %v1163_v38 = vpop.f32.mrb[1].mxu1 }
  0xef   : > { %v396_v34 = vadd.f32 %v1596_v29, %v395_v33  ;;  %v1148_v35 = vpop.f32.mrb[3].mxu0  ;;  %v446_v39 = vmax.f32 %v393_v31, 0.0  ;;  %v427_v41 = vpop.f32.mrb[2].mxu1 }
  0xf0   : > { %v454_v42 = vmax.f32 %v425_v37, 0.0  ;;  %v428_v43 = vadd.f32 %v1596_v29, %v427_v41  ;;  %v1164_v44 = vpop.f32.mrb[3].mxu1 }
  0xf1   : > { %v447_v40 = vmax.f32 %v396_v34, 0.0 }
  0xf2   : > { %v455_v47 = vmax.f32 %v428_v43, 0.0 }
  0xf3   : > { %v459_v45 = vpack.c.bf16 %v447_v40, %v446_v39 }
  0xf4   : > { %v400_v46 = vpop.f32.mrb[4].mxu0  ;;  %v463_v51 = vpack.c.bf16 %v455_v47, %v454_v42 }
  0xf5   : > { %v401_v48 = vadd.f32 %v1596_v29, %v400_v46  ;;  %v1151_v49 = vpop.f32.mrb[5].mxu0  ;;  %1182 = vmatmul.mubr.msk.bf16.vlgmr.msra.gmra.mrb[12].mxu1 %vm505_vm2, %v459_v45  ;;  %v432_v54 = vpop.f32.mrb[4].mxu1 }
  0xf6   : > { %v403_v50 = vpop.f32.mrb[6].mxu0  ;;  %1185 = vmatprep.mubr.msk.bf16.mxu1 %vm1441_vm0, %v1440_v1  ;;  %v433_v55 = vadd.f32 %v1596_v29, %v432_v54  ;;  %v1167_v56 = vpop.f32.mrb[5].mxu1 }
  0xf7   : > { %v404_v52 = vadd.f32 %v1596_v29, %v403_v50  ;;  %v1152_v53 = vpop.f32.mrb[7].mxu0  ;;  %v448_v57 = vmax.f32 %v401_v48, 0.0  ;;  %v435_v59 = vpop.f32.mrb[6].mxu1 }
  0xf8   : > { %v456_v60 = vmax.f32 %v433_v55, 0.0  ;;  %v436_v61 = vadd.f32 %v1596_v29, %v435_v59  ;;  %v1168_v62 = vpop.f32.mrb[7].mxu1 }
  0xf9   : > { %v449_v58 = vmax.f32 %v404_v52, 0.0 }
  0xfa   : > { %v457_v2 = vmax.f32 %v436_v61, 0.0 }
  0xfb   : > { %v460_v63 = vpack.c.bf16 %v449_v58, %v448_v57 }
  0xfc   : > { %v408_v0 = vpop.f32.mrb[8].mxu0  ;;  %v464_v6 = vpack.c.bf16 %v457_v2, %v456_v60 }
  0xfd   : > { %v409_v3 = vadd.f32 %v1596_v29, %v408_v0  ;;  %v1155_v4 = vpop.f32.mrb[9].mxu0  ;;  %1186 = vmatmul.mubr.msk.bf16.gmra.mrb[16].mxu1 %vm505_vm2, %v460_v63  ;;  %v440_v9 = vpop.f32.mrb[8].mxu1 }
  0xfe   : > { %v411_v5 = vpop.f32.mrb[10].mxu0  ;;  %1189 = vmatprep.mubr.msk.bf16.mxu1 %vm1441_vm0, %v1440_v1  ;;  %v1171_v10 = vpop.f32.mrb[9].mxu1  ;;  %v441_v25 = vadd.f32 %v1596_v29, %v440_v9 }
  0xff   : > { %v412_v7 = vadd.f32 %v1596_v29, %v411_v5  ;;  %v1156_v8 = vpop.f32.mrb[11].mxu0  ;;  %v450_v11 = vmax.f32 %v409_v3, 0.0  ;;  %v443_v13 = vpop.f32.mrb[10].mxu1 }
 0x100   : > { %v1172_v14 = vpop.f32.mrb[11].mxu1  ;;  %v458_v26 = vmax.f32 %v441_v25, 0.0 }
 0x101   : > { %v451_v12 = vmax.f32 %v412_v7, 0.0 }
 0x102   : > { %v465_v27 = vpack.c.bf16 %v458_v26, %v458_v26 }
 0x103   : > { %v461_v15 = vpack.c.bf16 %v451_v12, %v450_v11 }
 0x104   : > { %v416_v16 = vpop.f32.mrb[12].mxu0 }
 0x105   : > { %v417_v17 = vadd.f32 %v1596_v29, %v416_v16  ;;  %v1159_v18 = vpop.f32.mrb[13].mxu0  ;;  %1190 = vmatmul.mubr.msk.bf16.gmra.mrb[20].mxu1 %vm505_vm2, %v461_v15 }
 0x106   : > { %v419_v19 = vpop.f32.mrb[14].mxu0  ;;  %1193 = vmatprep.mubr.msk.bf16.mxu1 %vm1441_vm0, %v1440_v1 }
 0x107   : > { %v420_v20 = vadd.f32 %v1596_v29, %v419_v19  ;;  %v1160_v21 = vpop.f32.mrb[15].mxu0  ;;  %v452_v22 = vmax.f32 %v417_v17, 0.0 }
 0x109   : > { %v453_v23 = vmax.f32 %v420_v20, 0.0 }
 0x10b   : > { %v462_v24 = vpack.c.bf16 %v453_v23, %v452_v22 }
 0x10d   : > { %1194 = vmatmul.mubr.msk.bf16.gmra.mrb[24].mxu1 %vm505_vm2, %v462_v24 }
 0x10e   : > { %1197 = vmatprep.mubr.msk.bf16.mxu1 %vm1441_vm0, %v1440_v1 }
 0x115   : > { %1198 = vmatmul.mubr.msk.bf16.gmra.mrb[28].mxu1 %vm505_vm2, %v463_v51 }
 0x116   : > { %1201 = vmatprep.mubr.msk.bf16.mxu1 %vm1441_vm0, %v1440_v1 }
 0x11d   : > { %1202 = vmatmul.mubr.msk.bf16.gmra.mrb[32].mxu1 %vm505_vm2, %v464_v6 }
 0x11e   : > { %1205 = vmatprep.mubr.msk.bf16.mxu1 %vm1441_vm0, %v1440_v1 }
 0x125   : > { %1206 = vmatmul.mubr.msk.bf16.gmra.mrb[36].mxu1 %vm505_vm2, %v465_v27 }
 0x1c8   : > { %v561_v29 = vpop.f32.mrb[12].mxu1 }
 0x1c9   : > { %v562_v31 = vadd.f32 %v1636_v30, %v561_v29  ;;  %v1183_v32 = vpop.f32.mrb[13].mxu1 }
 0x1ca   : > { %v564_v33 = vpop.f32.mrb[14].mxu1 }
 0x1cb   : > { %v565_v34 = vadd.f32 %v1636_v30, %v564_v33  ;;  %v1184_v35 = vpop.f32.mrb[15].mxu1  ;;  %v615_v36 = vmax.f32 %v562_v31, 0.0 }
 0x1cd   : > { %v616_v37 = vmax.f32 %v565_v34, 0.0 }
 0x1cf   : > { %v628_v38 = vpack.c.bf16 %v616_v37, %v615_v36 }
 0x1d0   : > { %v569_v39 = vpop.f32.mrb[16].mxu1 }
 0x1d1   : > { %v570_v40 = vadd.f32 %v1636_v30, %v569_v39  ;;  %v1187_v41 = vpop.f32.mrb[17].mxu1  ;;  %1218 = vmatmul.mubr.msk.bf16.vlgmr.msra.gmra.mrb[16].mxu0 %vm505_vm2, %v628_v38 }
 0x1d2   : > { %v572_v42 = vpop.f32.mrb[18].mxu1  ;;  %1221 = vmatprep.mubr.msk.bf16.mxu0 %vm1441_vm0, %v1440_v1 }
 0x1d3   : > { %v573_v43 = vadd.f32 %v1636_v30, %v572_v42  ;;  %v1188_v44 = vpop.f32.mrb[19].mxu1  ;;  %v617_v45 = vmax.f32 %v570_v40, 0.0 }
 0x1d5   : > { %v618_v46 = vmax.f32 %v573_v43, 0.0 }
 0x1d7   : > { %v629_v47 = vpack.c.bf16 %v618_v46, %v617_v45 }
 0x1d8   : > { %v577_v48 = vpop.f32.mrb[20].mxu1 }
 0x1d9   : > { %v578_v49 = vadd.f32 %v1636_v30, %v577_v48  ;;  %v1191_v50 = vpop.f32.mrb[21].mxu1  ;;  %1222 = vmatmul.mubr.msk.bf16.gmra.mrb[20].mxu0 %vm505_vm2, %v629_v47 }
 0x1da   : > { %v580_v51 = vpop.f32.mrb[22].mxu1  ;;  %1225 = vmatprep.mubr.msk.bf16.mxu0 %vm1441_vm0, %v1440_v1 }
 0x1db   : > { %v581_v52 = vadd.f32 %v1636_v30, %v580_v51  ;;  %v1192_v53 = vpop.f32.mrb[23].mxu1  ;;  %v619_v54 = vmax.f32 %v578_v49, 0.0 }
 0x1dd   : > { %v620_v55 = vmax.f32 %v581_v52, 0.0 }
 0x1df   : > { %v630_v56 = vpack.c.bf16 %v620_v55, %v619_v54 }
 0x1e0   : > { %v585_v57 = vpop.f32.mrb[24].mxu1 }
 0x1e1   : > { %v586_v58 = vadd.f32 %v1636_v30, %v585_v57  ;;  %v1195_v59 = vpop.f32.mrb[25].mxu1  ;;  %1226 = vmatmul.mubr.msk.bf16.gmra.mrb[24].mxu0 %vm505_vm2, %v630_v56 }
 0x1e2   : > { %v588_v60 = vpop.f32.mrb[26].mxu1  ;;  %1229 = vmatprep.mubr.msk.bf16.mxu0 %vm1441_vm0, %v1440_v1 }
 0x1e3   : > { %v589_v61 = vadd.f32 %v1636_v30, %v588_v60  ;;  %v1196_v62 = vpop.f32.mrb[27].mxu1  ;;  %v621_v63 = vmax.f32 %v586_v58, 0.0 }
 0x1e5   : > { %v622_v0 = vmax.f32 %v589_v61, 0.0 }
 0x1e7   : > { %v631_v2 = vpack.c.bf16 %v622_v0, %v621_v63 }
 0x1e8   : > { %v593_v3 = vpop.f32.mrb[28].mxu1 }
 0x1e9   : > { %v594_v4 = vadd.f32 %v1636_v30, %v593_v3  ;;  %v1199_v5 = vpop.f32.mrb[29].mxu1  ;;  %1230 = vmatmul.mubr.msk.bf16.gmra.mrb[28].mxu0 %vm505_vm2, %v631_v2 }
 0x1ea   : > { %v596_v6 = vpop.f32.mrb[30].mxu1  ;;  %1233 = vmatprep.mubr.msk.bf16.mxu0 %vm1441_vm0, %v1440_v1 }
 0x1eb   : > { %v597_v7 = vadd.f32 %v1636_v30, %v596_v6  ;;  %v1200_v8 = vpop.f32.mrb[31].mxu1  ;;  %v623_v9 = vmax.f32 %v594_v4, 0.0 }
 0x1ed   : > { %v624_v10 = vmax.f32 %v597_v7, 0.0 }
 0x1ef   : > { %v632_v11 = vpack.c.bf16 %v624_v10, %v623_v9 }
 0x1f0   : > { %v601_v12 = vpop.f32.mrb[32].mxu1 }
 0x1f1   : > { %v602_v13 = vadd.f32 %v1636_v30, %v601_v12  ;;  %v1203_v14 = vpop.f32.mrb[33].mxu1  ;;  %1234 = vmatmul.mubr.msk.bf16.gmra.mrb[32].mxu0 %vm505_vm2, %v632_v11 }
 0x1f2   : > { %v604_v15 = vpop.f32.mrb[34].mxu1  ;;  %1237 = vmatprep.mubr.msk.bf16.mxu0 %vm1441_vm0, %v1440_v1 }
 0x1f3   : > { %v605_v16 = vadd.f32 %v1636_v30, %v604_v15  ;;  %v1204_v17 = vpop.f32.mrb[35].mxu1  ;;  %v625_v18 = vmax.f32 %v602_v13, 0.0 }
 0x1f5   : > { %v626_v19 = vmax.f32 %v605_v16, 0.0 }
 0x1f7   : > { %v633_v20 = vpack.c.bf16 %v626_v19, %v625_v18 }
 0x1f8   : > { %v609_v21 = vpop.f32.mrb[36].mxu1 }
 0x1f9   : > { %v610_v22 = vadd.f32 %v1636_v30, %v609_v21  ;;  %v1207_v23 = vpop.f32.mrb[37].mxu1  ;;  %1238 = vmatmul.mubr.msk.bf16.gmra.mrb[36].mxu0 %vm505_vm2, %v633_v20 }
 0x1fa   : > { %v612_v24 = vpop.f32.mrb[38].mxu1  ;;  %1241 = vmatprep.mubr.msk.bf16.mxu0 %vm1441_vm0, %v1440_v1 }
 0x1fb   : > { %v627_v25 = vmax.f32 %v610_v22, 0.0  ;;  %v1208_v26 = vpop.f32.mrb[39].mxu1 }
 0x1fd   : > { %v634_v27 = vpack.c.bf16 %v627_v25, %v627_v25 }
 0x201   : > { %1242 = vmatmul.mubr.msk.bf16.gmra.mrb[40].mxu0 %vm505_vm2, %v634_v27 }
 0x2a4   : > { %v729_v29 = vpop.f32.mrb[16].mxu0 }
 0x2a5   : > { %v730_v30 = vadd.f32 %v1088_v28, %v729_v29  ;;  %v1219_v31 = vpop.f32.mrb[17].mxu0 }
 0x2a6   : > { %v732_v32 = vpop.f32.mrb[18].mxu0 }
 0x2a7   : > { %784 = vst.msk [vmem:[%s1674_s30] sm:$0xff] %vm783_vm3, %v730_v30  ;;  %v733_v1 = vadd.f32 %v1088_v28, %v732_v32  ;;  %v1220_v33 = vpop.f32.mrb[19].mxu0 }
 0x2a9   : > { %785 = vst.msk [vmem:[%s1674_s30 + $0x8] sm:$0xff] %vm783_vm3, %v733_v1 }
 0x2ac   : > { %v737_v34 = vpop.f32.mrb[20].mxu0 }
 0x2ad   : > { %v738_v35 = vadd.f32 %v1088_v28, %v737_v34  ;;  %v1223_v36 = vpop.f32.mrb[21].mxu0 }
 0x2ae   : > { %v740_v37 = vpop.f32.mrb[22].mxu0 }
 0x2af   : > { %786 = vst.msk [vmem:[%s1674_s30 + $0x10] sm:$0xff] %vm783_vm3, %v738_v35  ;;  %v741_v38 = vadd.f32 %v1088_v28, %v740_v37  ;;  %v1224_v39 = vpop.f32.mrb[23].mxu0 }
 0x2b1   : > { %787 = vst.msk [vmem:[%s1674_s30 + $0x18] sm:$0xff] %vm783_vm3, %v741_v38 }
 0x2b4   : > { %v745_v40 = vpop.f32.mrb[24].mxu0 }
 0x2b5   : > { %v746_v41 = vadd.f32 %v1088_v28, %v745_v40  ;;  %v1227_v42 = vpop.f32.mrb[25].mxu0 }
 0x2b6   : > { %v748_v43 = vpop.f32.mrb[26].mxu0 }
 0x2b7   : > { %788 = vst.msk [vmem:[%s1674_s30 + $0x20] sm:$0xff] %vm783_vm3, %v746_v41  ;;  %v749_v44 = vadd.f32 %v1088_v28, %v748_v43  ;;  %v1228_v45 = vpop.f32.mrb[27].mxu0 }
 0x2b9   : > { %789 = vst.msk [vmem:[%s1674_s30 + $0x28] sm:$0xff] %vm783_vm3, %v749_v44 }
 0x2bc   : > { %v753_v46 = vpop.f32.mrb[28].mxu0 }
 0x2bd   : > { %v754_v47 = vadd.f32 %v1088_v28, %v753_v46  ;;  %v1231_v48 = vpop.f32.mrb[29].mxu0 }
 0x2be   : > { %v756_v49 = vpop.f32.mrb[30].mxu0 }
 0x2bf   : > { %790 = vst.msk [vmem:[%s1674_s30 + $0x30] sm:$0xff] %vm783_vm3, %v754_v47  ;;  %v757_v50 = vadd.f32 %v1088_v28, %v756_v49  ;;  %v1232_v51 = vpop.f32.mrb[31].mxu0 }
 0x2c1   : > { %791 = vst.msk [vmem:[%s1674_s30 + $0x38] sm:$0xff] %vm783_vm3, %v757_v50 }
 0x2c4   : > { %v761_v52 = vpop.f32.mrb[32].mxu0 }
 0x2c5   : > { %v762_v53 = vadd.f32 %v1088_v28, %v761_v52  ;;  %v1235_v54 = vpop.f32.mrb[33].mxu0 }
 0x2c6   : > { %v764_v55 = vpop.f32.mrb[34].mxu0 }
 0x2c7   : > { %792 = vst.msk [vmem:[%s1674_s30 + $0x40] sm:$0xff] %vm783_vm3, %v762_v53  ;;  %v765_v56 = vadd.f32 %v1088_v28, %v764_v55  ;;  %v1236_v57 = vpop.f32.mrb[35].mxu0 }
 0x2c9   : > { %793 = vst.msk [vmem:[%s1674_s30 + $0x48] sm:$0xff] %vm783_vm3, %v765_v56 }
 0x2cc   : > { %v769_v58 = vpop.f32.mrb[36].mxu0 }
 0x2cd   : > { %v770_v59 = vadd.f32 %v1088_v28, %v769_v58  ;;  %v1239_v60 = vpop.f32.mrb[37].mxu0 }
 0x2ce   : > { %v772_v61 = vpop.f32.mrb[38].mxu0 }
 0x2cf   : > { %794 = vst.msk [vmem:[%s1674_s30 + $0x50] sm:$0xff] %vm783_vm3, %v770_v59  ;;  %v773_v62 = vadd.f32 %v1088_v28, %v772_v61  ;;  %v1240_v63 = vpop.f32.mrb[39].mxu0 }
 0x2d1   : > { %795 = vst.msk [vmem:[%s1674_s30 + $0x58] sm:$0xff] %vm783_vm3, %v773_v62  ;;  %803 = sbr.rel (!%p1507_p4) target bundleno = 789 (0x315), region = 52 }
 0x2d4   : > { %v777_v0 = vpop.f32.mrb[40].mxu0 }
 0x2d5   : > { %v778_v2 = vadd.f32 %v1088_v28, %v777_v0  ;;  %v1243_v3 = vpop.f32.mrb[41].mxu0 }
 0x2d6   : > { %v780_v4 = vpop.f32.mrb[42].mxu0 }
 0x2d7   : > { %796 = vst.msk [vmem:[%s1674_s30 + $0x60] sm:$0xff] %vm783_vm3, %v778_v2  ;;  %v1244_v5 = vpop.f32.mrb[43].mxu0 }
 0x2d8   : > { %s1807_s24 = smov (!%p806_p8, %s805_s24), 13 }
 0x2d9   : > { %s1100_s15 = sshll.u32 %s1807_s24, 7 }
 0x2da   : > { %p1103_p9 = scmp.eq.s32.totalorder %s1100_s15, 0 }
 0x2db   : > { %1348 = sdivrem.u32 (!%p1103_p9), %s1807_s24, 13 }
 0x2dc   : > { %814 = sbr.rel (%p1103_p9) target bundleno = 789 (0x315), region = 56 }
 0x2e4   : > { %s1715_s9 = spop.drf %1348 }
 0x2e5   : > { %p1104_p10 = scmp.le.s32.totalorder %s1715_s9, 0 }
 0x2e6   : > { %s1800_s27 = smov (!%p1104_p10), %s1709_s14  ;;  %s1801_s12 = smov (!%p1104_p10), %s1674_s30 }
 0x2e7   : > { %1018 = sbr.rel (%p1104_p10) target bundleno = 760 (0x2f8), region = 132  ;;  %s1724_s16 = smov (!%p1104_p10), 0  }
 0x2e8   : > { %s1726_s17 = smov (!%p1104_p10), 0  }
 0x2ee LB: >> { %v902_v6 = vld [vmem:[%s1414_s12] sm:$0xff]  ;;  %v904_v7 = vld [vmem:[%s1414_s12 + $0x8] sm:$0xff]  ;;  %v906_v8 = vld [vmem:[%s1414_s12 + $0x10] sm:$0xff]  ;;  %s928_s18 = sadd.s32 1, %s1418_s16  ;;  %s896_s17 = sadd.s32 1, %s1422_s17   ;;  %s1422_s17 = sphi %s1726_s17, %s896_s17   ;;  %s1418_s16 = sphi %s1724_s16, %s1802_s16   ;;  %s1414_s12 = sphi %s1801_s12, %s933_s12   ;;  %s1410_s27 = sphi %s1800_s27, %s934_s27  }
 0x2ef   : >> { %903 = vst [vmem:[%s1410_s27] sm:$0xff] %v902_v6  ;;  %905 = vst [vmem:[%s1410_s27 + $0x8] sm:$0xff] %v904_v7  ;;  %v908_v9 = vld [vmem:[%s1414_s12 + $0x18] sm:$0xff]  ;;  %v910_v10 = vld [vmem:[%s1414_s12 + $0x20] sm:$0xff]  ;;  %p929_p11 = scmp.ge.s32.totalorder %s928_s18, %s1715_s9  ;;  %p895_p12 = scmp.ge.s32.totalorder %s896_s17, %s1715_s9 }
 0x2f0   : >> { %907 = vst [vmem:[%s1410_s27 + $0x10] sm:$0xff] %v906_v8  ;;  %v912_v11 = vld [vmem:[%s1414_s12 + $0x28] sm:$0xff]  ;;  %909 = vst [vmem:[%s1410_s27 + $0x18] sm:$0xff] %v908_v9  ;;  %v914_v12 = vld [vmem:[%s1414_s12 + $0x30] sm:$0xff] }
 0x2f1   : >> { %911 = vst [vmem:[%s1410_s27 + $0x20] sm:$0xff] %v910_v10  ;;  %913 = vst [vmem:[%s1410_s27 + $0x28] sm:$0xff] %v912_v11  ;;  %v916_v13 = vld [vmem:[%s1414_s12 + $0x38] sm:$0xff]  ;;  %v918_v14 = vld [vmem:[%s1414_s12 + $0x40] sm:$0xff]  ;;  %s1809_s18 = smov (%p929_p11, %s928_s18), 0  ;;  %898 = sbr.rel (!%p895_p12) target bundleno = 750 (0x2ee), region = 138 }
 0x2f2   : >> { %915 = vst [vmem:[%s1410_s27 + $0x30] sm:$0xff] %v914_v12  ;;  %917 = vst [vmem:[%s1410_s27 + $0x38] sm:$0xff] %v916_v13  ;;  %v920_v15 = vld [vmem:[%s1414_s12 + $0x48] sm:$0xff]  ;;  %v922_v16 = vld [vmem:[%s1414_s12 + $0x50] sm:$0xff]  ;;  %s931_s19 = smul.u32 104, %s1809_s18  ;;  %s1802_s16 = smov %s1809_s18 }
 0x2f3   : >> { %919 = vst [vmem:[%s1410_s27 + $0x40] sm:$0xff] %v918_v14  ;;  %v924_v17 = vld [vmem:[%s1414_s12 + $0x58] sm:$0xff]  ;;  %921 = vst [vmem:[%s1410_s27 + $0x48] sm:$0xff] %v920_v15  ;;  %v926_v18 = vld [vmem:[%s1414_s12 + $0x60] sm:$0xff] }
 0x2f4   : >> { %923 = vst [vmem:[%s1410_s27 + $0x50] sm:$0xff] %v922_v16  ;;  %925 = vst [vmem:[%s1410_s27 + $0x58] sm:$0xff] %v924_v17  ;;  %s933_s12 = scalar_lea.vmem %s1674_s30, %s931_s19 [#allocation2]  }
 0x2f5   : >> { %927 = vst [vmem:[%s1410_s27 + $0x60] sm:$0xff] %v926_v18  ;;  %s934_s27 = scalar_lea.vmem %s1709_s14, %s931_s19  }
 0x2f8 PF: > { %1350 = sdivrem.u32 %s1807_s24, 13 }
 0x2f9   : > { %s1105_s20 = smul.u32 104, %s1715_s9 }
 0x2fb   : > { %s939_s21 = scalar_lea.vmem %s1674_s30, %s1105_s20 [#allocation2]   ;;  %s941_s22 = scalar_lea.vmem %s1709_s14, %s1105_s20  }
 0x301   : > { %s1351_s23 = spop.drf %1350 }
 0x302   : > { %p1107_p13 = scmp.le.s32.totalorder %s1351_s23, 0 }
 0x303   : > { %s1424_s26 = smov (!%p1107_p13), %s941_s22   ;;  %s1428_s29 = smov (!%p1107_p13), %s939_s21  }
 0x304   : > { %1032 = sbr.rel (%p1107_p13) target bundleno = 789 (0x315), region = 143  ;;  %s1432_s10 = smov (!%p1107_p13), 0  }
 0x305   : > { %s1436_s11 = smov (!%p1107_p13), 0  }
 0x30b LB: >> { %v951_v19 = vld [vmem:[%s1430_s29] sm:$0xff]  ;;  %s953_s13 = sadd.s32 1, %s1434_s10  ;;  %s945_s11 = sadd.s32 1, %s1438_s11   ;;  %s1438_s11 = sphi %s1436_s11, %s945_s11   ;;  %s1434_s10 = sphi %s1432_s10, %s1433_s10   ;;  %s1430_s29 = sphi %s1428_s29, %s958_s29   ;;  %s1426_s26 = sphi %s1424_s26, %s959_s26  }
 0x30c   : >> { %952 = vst [vmem:[%s1426_s26] sm:$0xff] %v951_v19  ;;  %p954_p0 = scmp.ge.s32.totalorder %s953_s13, %s1351_s23  ;;  %p944_p1 = scmp.ge.s32.totalorder %s945_s11, %s1351_s23 }
 0x30e   : >> { %s1811_s13 = smov (%p954_p0, %s953_s13), 0  ;;  %947 = sbr.rel (!%p944_p1) target bundleno = 779 (0x30b), region = 149 }
 0x30f   : >> { %s1108_s30 = sshll.u32 %s1811_s13, 3  ;;  %s1433_s10 = smov %s1811_s13  }
 0x310   : >> { %s958_s29 = scalar_lea.vmem %s939_s21, %s1108_s30 [#allocation2]   ;;  %s959_s26 = scalar_lea.vmem %s941_s22, %s1108_s30  }
 0x315 PF: > { %p14_p2 = scmp.ge.s32.totalorder %s1497_s28, 4   ;;  %s1803_s24 = smov %s1402_s25 }
 0x316   : > { %s1804_s25 = smov %s1505_s8  ;;  %s1805_s26 = smov %s1497_s28 }
 0x317   :  { %16 = sbr.rel (!%p14_p2) target bundleno = 2 (0x2), region = 160 }

</bundles_post_ra>
